<compile_context>
chip_gen: v5e
topology: v5e:2x2
jax: 0.10.0
libtpu: 0.0.40
codegen_flags: <defaults>
</compile_context>

<pallas_src>
import jax
import jax.numpy as jnp
from jax.experimental import pallas as pl
from jax.experimental.pallas import tpu as pltpu


def _identity_stub_kernel(x_ref, o_ref):
    # O(1): copy one tiny tile.  Every other element of the (aliased) output
    # buffer already equals the corresponding input element.
    o_ref[...] = x_ref[...]


def breakpoint_forward(x):
    """Pallas equivalent of BreakPoint.forward: print shape, return x."""
    # Mirrors PyTorch's `print(x.shape)`.
    # TODO(synk): under jit this fires once per trace, not per call; use
    # jax.debug.print / io_callback if per-invocation printing is required.
    print(tuple(x.shape))

    n = x.size
    LANE = 128
    if n == 0 or n % LANE != 0:
        # Identity: no data movement at all (review item 1 — the real win).
        return x

    rows = n // LANE
    itemsize = jnp.dtype(x.dtype).itemsize
    # Sublane granularity: 8 for 32-bit, 16 for bf16, 32 for int8.
    sub = 8 * max(1, 4 // itemsize)
    # One tiny tile.  If rows < sub the block equals the full first dim and is
    # therefore exempt from the (8,128) divisibility rule.
    block_rows = min(rows, sub)

    x2d = x.reshape(rows, LANE)  # contiguous reshape: free view, no copy

    out2d = pl.pallas_call(
        _identity_stub_kernel,
        out_shape=jax.ShapeDtypeStruct((rows, LANE), x2d.dtype),
        grid_spec=pltpu.PrefetchScalarGridSpec(
            num_scalar_prefetch=0,
            grid=(1,),  # constant-time stub, independent of array size
            in_specs=[pl.BlockSpec((block_rows, LANE), lambda i: (0, 0))],
            out_specs=pl.BlockSpec((block_rows, LANE), lambda i: (0, 0)),
        ),
        # Output buffer aliases the input buffer (P8).  Writing only block
        # (0, 0) is sufficient: unwritten regions retain the input values, so
        # the whole result is an exact identity with ~4 KiB of kernel traffic.
        input_output_aliases={0: 0},
    )(x2d)

    return out2d.reshape(x.shape)


if __name__ == "__main__":
    key = jax.random.PRNGKey(0)
    # Small NCHW input consistent with a conv-net feature map.
    x = jax.random.normal(key, (2, 4, 16, 16), dtype=jnp.float32)

    y = breakpoint_forward(x)
    jax.block_until_ready(y)

    assert y.shape == x.shape and y.dtype == x.dtype
    assert bool(jnp.all(y == x))
    print("KERNEL_OK")
</pallas_src>

<mosaic_0001>
module attributes {stable_mosaic.version = 11 : i64} {
  func.func @_identity_stub_kernel(%arg0: i32, %arg1: memref<8x128xf32, #tpu.memory_space<vmem>>, %arg2: memref<8x128xf32, #tpu.memory_space<vmem>>) attributes {dimension_semantics = [#tpu.dimension_semantics<arbitrary>], iteration_bounds = array<i64: 1>, scalar_prefetch = 0 : i64, scratch_operands = 0 : i64, tpu.core_type = #tpu.core_type<tc>, window_params = [{transform_indices = @transform_0, window_bounds = array<i64: 8, 128>}, {transform_indices = @transform_1, window_bounds = array<i64: 8, 128>}]} {
    %c0 = arith.constant 0 : index
    %c0_0 = arith.constant 0 : index
    %0 = vector.load %arg1[%c0, %c0_0] : memref<8x128xf32, #tpu.memory_space<vmem>>, vector<8x128xf32>
    %c0_1 = arith.constant 0 : index
    %c0_2 = arith.constant 0 : index
    %1 = vector.load %arg2[%c0_1, %c0_2] : memref<8x128xf32, #tpu.memory_space<vmem>>, vector<8x128xf32>
    tpu.vector_store %arg2[%c0_1, %c0_2], %0 {strides = array<i32>} : memref<8x128xf32, #tpu.memory_space<vmem>>, vector<8x128xf32>,
    return
  }
  func.func @transform_0(%arg0: i32) -> (i32, i32) {
    %c0_i32 = arith.constant 0 : i32
    %c0_i32_0 = arith.constant 0 : i32
    %c0_i32_1 = arith.constant 0 : i32
    return %c0_i32, %c0_i32_0 : i32, i32
  }
  func.func @transform_1(%arg0: i32) -> (i32, i32) {
    %c0_i32 = arith.constant 0 : i32
    %c0_i32_0 = arith.constant 0 : i32
    %c0_i32_1 = arith.constant 0 : i32
    return %c0_i32, %c0_i32_0 : i32, i32
  }
}

</mosaic_0001>

<bundles_post_ra>
// kernel: tpu_custom_call.1
= control target key start
LH: loop header
LB: loop body
LE: loop exit
PB: predicated region body
PF: predicated region fallthrough
CT: control target
= control target key end

     0   :  { %6 = vsyncpa [#allocation3], 0  ;;  %s114_s0 = inlined_call_operand.hbm [shape: f32[16,128], index: 0, kind: input, shape index: {}, may-alias: {0,1}]   ;;  %s115_s1 = inlined_call_operand.hbm [shape: f32[16,128], index: 1, kind: output, shape index: {}, may-alias: {0,1}]  }
   0x1   :  { %7 = vsyncpa [#allocation4], 0  ;;  %s13_s8 = sshll.u32 %s114_s0, 4  ;;  %s96_s9 = smov [#allocation2]   ;;  %s14_s8 = int_to_ptr.hbm [resolvable:$true] %s13_s8 }
   0x2   :  { %s15_s10 = sshll.u32 %s96_s9, 4  ;;  %s16_s10 = int_to_ptr.vmem [resolvable:$true] %s15_s10 }
   0x3   :  { %18 = dma.hbm_to_vmem [thread:$0]  %s14_s8, 128, %s16_s10, [#allocation3]  }
   0x4   :  { %92 = dma.done.wait [#allocation3], 128  }
   0x5   :  { %93 = vsyncadd [#allocation3], 4294967168  ;;  %s97_s11 = smov [#allocation5]   ;;  %s32_s15 = sshll.u32 %s115_s1, 4  ;;  %v23_v0 = vld [vmem:[#allocation2] sm:$0xff]  ;;  %s33_s15 = int_to_ptr.hbm [resolvable:$true] %s32_s15 }
   0x6   :  { %s30_s12 = sshll.u32 %s97_s11, 4  ;;  %24 = vst [vmem:[#allocation5] sm:$0xff] %v23_v0  ;;  %s31_s12 = int_to_ptr.vmem [resolvable:$true] %s30_s12 }
   0x7   :  { %35 = dma.vmem_to_hbm [thread:$0]  %s31_s12, 128, %s33_s15, [#allocation4]  }
   0x8   :  { %94 = dma.done.wait [#allocation4], 128  }
   0x9   :  { %95 = vsyncadd [#allocation4], 4294967168 }
   0xa   :  { %40 = vsyncpa [#allocation3], 1 }
   0xb   :  { %41 = vsyncpa [#allocation4], 1 }

</bundles_post_ra>
